<compile_context>
chip_gen: v7x
topology: tpu7x:2x2x1
jax: 0.10.0
libtpu: 0.0.40
codegen_flags: <defaults>
</compile_context>

<pallas_src>
import functools

import jax
import jax.numpy as jnp
from jax.experimental import pallas as pl
from jax.experimental.pallas import tpu as pltpu

_LANE = 128
_SUBLANE = 8
_TARGET_BLOCK_BYTES = 2 * 1024 * 1024   # ~2 MiB per x block (safe on v5e/v6e/v7x)
_SMALL_INPUT_BYTES = 256 * 1024         # below this, skip Pallas entirely


def _add_pe_kernel(x_ref, pe_ref, o_ref):
    # x_ref: (TB, TC)   pe_ref: (1, TC)   o_ref: (TB, TC)
    # Single VPU add per vreg with a sublane broadcast; HBM DMA is the bottleneck.
    o_ref[...] = x_ref[...] + pe_ref[...]


def make_positional_encoding_table(d_model, max_len=10000, dtype=jnp.float32):
    """Builds the same pe table as the PyTorch module."""
    assert d_model % 2 == 0, "d_model must be even (same assumption as the PyTorch module)"
    position = jnp.arange(max_len, dtype=jnp.float32)[:, None]            # (max_len, 1)
    div_term = jnp.exp(
        jnp.arange(0, d_model, 2, dtype=jnp.float32) * (-jnp.log(10000.0) / d_model)
    )                                                                      # (d_model//2,)
    angles = position * div_term                                           # (max_len, d_model//2)
    pe = jnp.zeros((max_len, d_model), dtype=dtype)
    pe = pe.at[:, 0::2].set(jnp.sin(angles).astype(dtype))
    pe = pe.at[:, 1::2].set(jnp.cos(angles).astype(dtype))
    return pe


def _round_down(v, m):
    return (v // m) * m


def _round_up(v, m):
    return ((v + m - 1) // m) * m


def _pick_tiles(b, n, itemsize):
    """Byte-targeted tiles: ~2 MiB x blocks, >=2 parallel blocks when possible."""
    # Batch tile: full batch is always layout-legal; cap only if batch is huge
    # (512 is a multiple of 8, satisfying the sublane constraint when tb < b).
    tb = b if b <= 512 else 512

    # Lane tile: target ~_TARGET_BLOCK_BYTES per x block, multiple of 128 (or full n).
    max_tc = max(_TARGET_BLOCK_BYTES // max(tb * itemsize, 1), _LANE)
    tc = n if max_tc >= n else _round_down(max_tc, _LANE)

    # v7x has 2 TensorCores and shards "parallel" grid axes across them:
    # guarantee at least 2 blocks when the input allows it.
    if pl.cdiv(b, tb) * pl.cdiv(n, tc) == 1:
        if n >= 2 * _LANE:
            tc = _round_up(pl.cdiv(n, 2), _LANE)
        elif b >= 2 * _SUBLANE:
            tb = _round_up(pl.cdiv(b, 2), _SUBLANE)
    return tb, tc


@functools.partial(jax.jit, static_argnames=("force_pallas",))
def positional_encoding(x, pe_table, force_pallas=False):
    """y = x + pe_table[:x.shape[1]] (broadcast over batch).

    x:        (batch, seq_len, d_model)
    pe_table: (max_len, d_model), max_len >= seq_len
    returns   (batch, seq_len, d_model)
    """
    b, s, d = x.shape
    n = s * d

    x2d = x.reshape(b, n)
    pe2d = pe_table[:s].reshape(1, n).astype(x.dtype)

    itemsize = jnp.dtype(x.dtype).itemsize
    total_bytes = b * n * itemsize

    # Fast path: for tiny inputs the fixed Pallas launch + DMA setup dwarfs the
    # add; XLA will fuse this broadcast-add into neighboring ops for free.
    if not force_pallas and total_bytes < _SMALL_INPUT_BYTES:
        return (x2d + pe2d).reshape(b, s, d)

    tb, tc = _pick_tiles(b, n, itemsize)

    # Batch axis is the INNERMOST grid axis: the pe block index (0, j) is
    # constant across consecutive steps, so the pe tile stays resident in VMEM.
    grid = (pl.cdiv(n, tc), pl.cdiv(b, tb))

    out = pl.pallas_call(
        _add_pe_kernel,
        out_shape=jax.ShapeDtypeStruct((b, n), x.dtype),
        grid=grid,
        in_specs=[
            pl.BlockSpec((tb, tc), lambda j, i: (i, j)),   # x tile
            pl.BlockSpec((1, tc), lambda j, i: (0, j)),    # pe tile (resident across batch)
        ],
        out_specs=pl.BlockSpec((tb, tc), lambda j, i: (i, j)),
        compiler_params=pltpu.CompilerParams(
            dimension_semantics=("parallel", "parallel"),
        ),
    )(x2d, pe2d)

    return out.reshape(b, s, d)


if __name__ == "__main__":
    # Small shapes consistent with the module's forward:
    # (batch, seq_len, d_model) -> (batch, seq_len, d_model)
    batch, seq_len, d_model = 2, 16, 32
    max_len = 10000  # same default as the PyTorch module

    key = jax.random.PRNGKey(0)
    x = jax.random.normal(key, (batch, seq_len, d_model), dtype=jnp.float32)

    pe_table = make_positional_encoding_table(d_model, max_len=max_len)
    y_ref = x + pe_table[:seq_len][None, :, :]

    # Force the Pallas path so the kernel is exercised on the small test shape.
    y = jax.block_until_ready(positional_encoding(x, pe_table, force_pallas=True))
    assert y.shape == (batch, seq_len, d_model)
    assert jnp.allclose(y, y_ref, atol=1e-6, rtol=1e-6)

    # Default auto path (tiny input takes the fused plain-JAX fast path).
    y_auto = jax.block_until_ready(positional_encoding(x, pe_table))
    assert jnp.allclose(y_auto, y_ref, atol=1e-6, rtol=1e-6)

    print("KERNEL_OK")
</pallas_src>

<mosaic_0001>
module attributes {stable_mosaic.version = 11 : i64} {
  func.func @_add_pe_kernel(%arg0: i32, %arg1: i32, %arg2: memref<2x256xf32, #tpu.memory_space<vmem>>, %arg3: memref<1x256xf32, #tpu.memory_space<vmem>>, %arg4: memref<2x256xf32, #tpu.memory_space<vmem>>) attributes {dimension_semantics = [#tpu.dimension_semantics<parallel>, #tpu.dimension_semantics<parallel>], iteration_bounds = array<i64: 2, 1>, scalar_prefetch = 0 : i64, scratch_operands = 0 : i64, tpu.core_type = #tpu.core_type<tc>, window_params = [{transform_indices = @transform_0, window_bounds = array<i64: 2, 256>}, {transform_indices = @transform_1, window_bounds = array<i64: 1, 256>}, {transform_indices = @transform_2, window_bounds = array<i64: 2, 256>}]} {
    %c0 = arith.constant 0 : index
    %c0_0 = arith.constant 0 : index
    %0 = vector.load %arg2[%c0, %c0_0] : memref<2x256xf32, #tpu.memory_space<vmem>>, vector<2x256xf32>
    %c0_1 = arith.constant 0 : index
    %c0_2 = arith.constant 0 : index
    %1 = vector.load %arg3[%c0_1, %c0_2] : memref<1x256xf32, #tpu.memory_space<vmem>>, vector<1x256xf32>
    %2 = vector.broadcast %1 : vector<1x256xf32> to vector<2x256xf32>
    %3 = arith.addf %0, %2 : vector<2x256xf32>
    %c0_3 = arith.constant 0 : index
    %c0_4 = arith.constant 0 : index
    %4 = vector.load %arg4[%c0_3, %c0_4] : memref<2x256xf32, #tpu.memory_space<vmem>>, vector<2x256xf32>
    tpu.vector_store %arg4[%c0_3, %c0_4], %3 {strides = array<i32>} : memref<2x256xf32, #tpu.memory_space<vmem>>, vector<2x256xf32>,
    return
  }
  func.func @transform_0(%arg0: i32, %arg1: i32) -> (i32, i32) {
    %c0_i32 = arith.constant 0 : i32
    return %arg1, %arg0 : i32, i32
  }
  func.func @transform_1(%arg0: i32, %arg1: i32) -> (i32, i32) {
    %c0_i32 = arith.constant 0 : i32
    %c0_i32_0 = arith.constant 0 : i32
    return %c0_i32, %arg0 : i32, i32
  }
  func.func @transform_2(%arg0: i32, %arg1: i32) -> (i32, i32) {
    %c0_i32 = arith.constant 0 : i32
    return %arg1, %arg0 : i32, i32
  }
}

</mosaic_0001>

<bundles_post_ra>
// kernel: positional_encoding.1
= control target key start
LH: loop header
LB: loop body
LE: loop exit
PB: predicated region body
PF: predicated region fallthrough
CT: control target
= control target key end

     0   :  { %s397_s9 = smov 0   ;;  %s399_s10 = smov 0   ;;  %s433_s0 = inlined_call_operand.vmem [shape: f32[2,512], index: 0, kind: input, shape index: {}]   ;;  %s434_s1 = inlined_call_operand.vmem [shape: f32[1,512], index: 1, kind: input, shape index: {}]   ;;  %s435_s2 = inlined_call_operand.vmem [shape: f32[2,512], index: 2, kind: output, shape index: {}]  }
   0x1   :  { %s401_s11 = smov 0  }
   0x2 LB: > { %s24_s12 = sadd.s32 1, %s375_s10  ;;  %p324_p0 = scmp.ge.s32.totalorder %s379_s11, 1  ;;  %s379_s11 = sphi %s401_s11, %s12_s11   ;;  %s375_s10 = sphi %s399_s10, %s437_s10   ;;  %s371_s9 = sphi %s397_s9, %s436_s9  }
   0x3   : > { %p26_p1 = scmp.ge.s32.totalorder %s24_s12, 2  ;;  %p143_p2 = scmp.lt.s32.totalorder %s379_s11, 3 }
   0x5   : > { %s439_s12 = smov (%p26_p1, %s24_s12), 0  ;;  %p144_p3 = pnand %p324_p0, %p143_p2 }
   0x6   : > { %s325_s13 = sshll.u32 (!%p144_p3), %s371_s9, 1  ;;  %v205_v0 = vlaneseq (!%p144_p3)  ;;  %v381_v1 = vmov (!%p144_p3), 1983009808  }
   0x7   : > { %147 = sbr.rel (%p144_p3) target bundleno = 26 (0x1a), region = 28  ;;  %p180_p4 = scmp.lt.s32.totalorder (!%p144_p3), %s325_s13, 3  ;;  %v215_v2 = vunpack.c.l.s4 (!%p144_p3), %v381_v1 }
   0x8   : > { %v206_v3 = vshrl.u32 (!%p144_p3), %v205_v0, 7 }
   0x9   : > { %v216_v4 = vunpack.c.0.s8 (!%p144_p3), %v215_v2 }
   0xa   : > { %v207_v5 = vsub.s32 (!%p144_p3), 0, %v206_v3  ;;  %v211_v6 = vsub.s32 (!%p144_p3), 1, %v206_v3 }
   0xb   : > { %v219_v10 = vsub.s32 (!%p144_p3), %v216_v4, %v206_v3 }
   0xe   : > { %s441_s13 = smov (!%p180_p4, %s325_s13), 3 }
   0xf   : > { %s326_s14 = sshll.u32 %s441_s13, 1  ;;  %s190_s17 = scalar_lea.vmem %s434_s1, %s441_s13 }
  0x10   : > { %v203_v7 = vld [vmem:[%s190_s17] sm:$0x3]  ;;  %s185_s20 = scalar_lea.vmem %s433_s0, %s326_s14  ;;  %s200_s23 = scalar_lea.vmem %s435_s2, %s326_s14 }
  0x11   : > { %v208_v8 = vrot.slane %v203_v7, %v207_v5  ;;  %v212_v9 = vrot.slane %v203_v7, %v211_v6  ;;  %v202_v12 = vld [vmem:[%s185_s20] sm:$0xf] }
  0x13   : > { %v213_v11 = vcombine.low %v208_v8, %v212_v9 }
  0x15   : > { %v220_v13 = vrot.slane %v213_v11, %v219_v10 }
  0x17   : > { %v222_v14 = vadd.f32 %v220_v13, %v202_v12 }
  0x19   : > { %223 = vst [vmem:[%s200_s23] sm:$0xf] %v222_v14 }
  0x1a PF: > { %s12_s11 = sadd.s32 1, %s379_s11   ;;  %s436_s9 = smov %s375_s10 }
  0x1b   : > { %p9_p5 = scmp.ge.s32.totalorder %s12_s11, 4   ;;  %s437_s10 = smov %s439_s12 }
  0x1d   :  { %11 = sbr.rel (!%p9_p5) target bundleno = 2 (0x2), region = 61 }

</bundles_post_ra>
